<compile_context>
chip_gen: v7x
topology: tpu7x:2x2x1
jax: 0.10.0
libtpu: 0.0.40
codegen_flags: <defaults>
</compile_context>

<pallas_src>
import math

import jax
import jax.numpy as jnp
from jax.experimental import pallas as pl
from jax.experimental.pallas import tpu as pltpu


D_MODEL = 3072  # hard-coded in the PyTorch module: PositionEmbedding(3072, dropout=0.1)


def sinusoidal_position_table(max_len, d_model, dtype=jnp.float32):
    """Classic 'Attention is All You Need' sinusoidal PE buffer (computed at init).

    pe[pos, 2i]   = sin(pos / 10000^(2i/d))
    pe[pos, 2i+1] = cos(pos / 10000^(2i/d))
    """
    # TODO(synk): if the reference PositionEmbedding is a *learned* embedding
    #             instead of sinusoidal, swap this table for the learned weights.
    pos = jnp.arange(max_len, dtype=jnp.float32)[:, None]                  # (S, 1)
    div = jnp.exp(jnp.arange(0, d_model, 2, dtype=jnp.float32)
                  * (-math.log(10000.0) / d_model))                        # (D/2,)
    ang = pos * div[None, :]                                               # (S, D/2)
    pe = jnp.stack([jnp.sin(ang), jnp.cos(ang)], axis=-1).reshape(max_len, d_model)
    return pe.astype(dtype)


# ---------------------------------------------------------------------------
# Fused kernel: out[bt, :, :] = concat([cls[bt], patch[bt]], axis=1) + pe
# One grid step per batch tile; everything stays lane-dense (last dim 3072),
# and the output is written with a single unmasked full-block store.
# ---------------------------------------------------------------------------
def _image_preprocess_kernel(cls_ref, patch_ref, pe_ref, o_ref):
    # Block shapes: cls (Bt,1,D), patch (Bt,N,D), pe (S,D), out (Bt,S,D); S=N+1.
    seq = jnp.concatenate([cls_ref[...], patch_ref[...]], axis=1)      # (Bt, S, D)
    o_ref[...] = (seq + pe_ref[...][None]).astype(o_ref.dtype)
    # TODO(synk): dropout(p=0.1) inside PositionEmbedding is training-only
    #             (stochastic); implemented as identity (eval semantics).


def _choose_batch_tile(B, S, D, itemsize, budget_bytes=12 << 20):
    """Largest divisor of B whose double-buffered per-step footprint fits the budget.

    Per batch element per step: (cls+patches) read + out written = 2*S*D elems,
    each double-buffered -> 4*S*D*itemsize bytes; the PE tile adds a fixed
    2*S*D*itemsize.  12 MiB keeps us inside v5e's 16 MiB scoped-VMEM default
    (and trivially inside v6e/v7x).
    """
    per_b = 4 * S * D * itemsize
    fixed = 2 * S * D * itemsize
    bt_max = max(1, (budget_bytes - fixed) // per_b)
    bt = 1
    for d in range(1, B + 1):
        if B % d == 0 and d <= bt_max:
            bt = d
    return bt


def image_preprocess(x, cls_token, pe):
    """x: (B, C, H, W) image; cls_token: (B, 1, D); pe: (S, D) with S = n_patches+1."""
    B = x.shape[0]
    S, D = pe.shape
    n_patches = S - 1
    # Equivalent of torch `x.view(n_batch, n_h*n_w, -1)` (row-major, zero-copy).
    patches = x.reshape(B, n_patches, D)
    assert cls_token.shape == (B, 1, D)

    Bt = _choose_batch_tile(B, S, D, jnp.dtype(x.dtype).itemsize)

    return pl.pallas_call(
        _image_preprocess_kernel,
        out_shape=jax.ShapeDtypeStruct((B, S, D), x.dtype),
        grid_spec=pltpu.PrefetchScalarGridSpec(
            num_scalar_prefetch=0,
            grid=(B // Bt,),
            in_specs=[
                pl.BlockSpec((Bt, 1, D), lambda b: (b, 0, 0)),          # cls tokens
                pl.BlockSpec((Bt, n_patches, D), lambda b: (b, 0, 0)),  # patches
                pl.BlockSpec((S, D), lambda b: (0, 0)),                 # PE buffer
            ],
            out_specs=pl.BlockSpec((Bt, S, D), lambda b: (b, 0, 0)),
        ),
        compiler_params=pltpu.CompilerParams(
            dimension_semantics=("parallel",)),
    )(cls_token, patches, pe)


if __name__ == "__main__":
    # Geometry implied by the hard-coded d_model = 3072: C * H * W / (n_h * n_w)
    # must equal 3072, e.g. C=3, img=64, patch=32 -> 4 patches of dim 3072.
    B, C = 2, 3
    img_size, patch_size = 64, 32
    n_h = n_w = img_size // patch_size
    n_patches = n_h * n_w                      # 4
    S = n_patches + 1                          # +1 cls token -> seq len 5
    D = (C * img_size * img_size) // n_patches # 3072
    assert D == D_MODEL, D

    key = jax.random.PRNGKey(0)
    kx, kc = jax.random.split(key)
    x = jax.random.normal(kx, (B, C, img_size, img_size), jnp.float32)
    # TODO(synk): the PyTorch module draws a fresh torch.randn cls token every
    #             forward; here it is drawn once from an explicit JAX key.
    cls_token = jax.random.normal(kc, (B, 1, D), jnp.float32)

    pe = sinusoidal_position_table(S, D, dtype=x.dtype)  # init-time buffer (register_buffer)

    fwd = jax.jit(image_preprocess)
    out = fwd(x, cls_token, pe)
    out = jax.block_until_ready(out)

    assert out.shape == (B, S, D), out.shape
    assert bool(jnp.all(jnp.isfinite(out)))

    # Pure-JAX reference: concat + positional-encoding add (dropout = identity).
    ref = jnp.concatenate([cls_token, x.reshape(B, n_patches, D)], axis=1) + pe[None]
    assert bool(jnp.allclose(out, ref, atol=1e-5, rtol=1e-5))

    print("KERNEL_OK")
</pallas_src>

<mosaic_0001>
module attributes {stable_mosaic.version = 11 : i64} {
  func.func @_image_preprocess_kernel(%arg0: i32, %arg1: memref<2x1x3072xf32, #tpu.memory_space<vmem>>, %arg2: memref<2x4x3072xf32, #tpu.memory_space<vmem>>, %arg3: memref<5x3072xf32, #tpu.memory_space<vmem>>, %arg4: memref<2x5x3072xf32, #tpu.memory_space<vmem>>) attributes {dimension_semantics = [#tpu.dimension_semantics<parallel>], iteration_bounds = array<i64: 1>, scalar_prefetch = 0 : i64, scratch_operands = 0 : i64, tpu.core_type = #tpu.core_type<tc>, window_params = [{transform_indices = @transform_0, window_bounds = array<i64: 2, 1, 3072>}, {transform_indices = @transform_1, window_bounds = array<i64: 2, 4, 3072>}, {pipeline_mode = #tpu.pipeline_mode<synchronous>, transform_indices = @transform_2, window_bounds = array<i64: 5, 3072>}, {transform_indices = @transform_3, window_bounds = array<i64: 2, 5, 3072>}]} {
    %c0 = arith.constant 0 : index
    %c0_0 = arith.constant 0 : index
    %c0_1 = arith.constant 0 : index
    %0 = vector.load %arg1[%c0, %c0_0, %c0_1] : memref<2x1x3072xf32, #tpu.memory_space<vmem>>, vector<2x1x3072xf32>
    %c0_2 = arith.constant 0 : index
    %c0_3 = arith.constant 0 : index
    %c0_4 = arith.constant 0 : index
    %1 = vector.load %arg2[%c0_2, %c0_3, %c0_4] : memref<2x4x3072xf32, #tpu.memory_space<vmem>>, vector<2x4x3072xf32>
    %2 = tpu.concatenate %0, %1 in 1 : vector<2x1x3072xf32>, vector<2x4x3072xf32> -> vector<2x5x3072xf32>
    %c0_5 = arith.constant 0 : index
    %c0_6 = arith.constant 0 : index
    %3 = vector.load %arg3[%c0_5, %c0_6] : memref<5x3072xf32, #tpu.memory_space<vmem>>, vector<5x3072xf32>
    %4 = vector.shape_cast %3 : vector<5x3072xf32> to vector<1x5x3072xf32>
    %5 = vector.broadcast %4 : vector<1x5x3072xf32> to vector<2x5x3072xf32>
    %6 = arith.addf %2, %5 : vector<2x5x3072xf32>
    %c0_7 = arith.constant 0 : index
    %c0_8 = arith.constant 0 : index
    %c0_9 = arith.constant 0 : index
    %7 = vector.load %arg4[%c0_7, %c0_8, %c0_9] : memref<2x5x3072xf32, #tpu.memory_space<vmem>>, vector<2x5x3072xf32>
    tpu.vector_store %arg4[%c0_7, %c0_8, %c0_9], %6 {strides = array<i32>} : memref<2x5x3072xf32, #tpu.memory_space<vmem>>, vector<2x5x3072xf32>,
    return
  }
  func.func @transform_0(%arg0: i32) -> (i32, i32, i32) {
    %c0_i32 = arith.constant 0 : i32
    %c0_i32_0 = arith.constant 0 : i32
    %c0_i32_1 = arith.constant 0 : i32
    return %arg0, %c0_i32, %c0_i32_0 : i32, i32, i32
  }
  func.func @transform_1(%arg0: i32) -> (i32, i32, i32) {
    %c0_i32 = arith.constant 0 : i32
    %c0_i32_0 = arith.constant 0 : i32
    %c0_i32_1 = arith.constant 0 : i32
    return %arg0, %c0_i32, %c0_i32_0 : i32, i32, i32
  }
  func.func @transform_2(%arg0: i32) -> (i32, i32) {
    %c0_i32 = arith.constant 0 : i32
    %c0_i32_0 = arith.constant 0 : i32
    %c0_i32_1 = arith.constant 0 : i32
    return %c0_i32, %c0_i32_0 : i32, i32
  }
  func.func @transform_3(%arg0: i32) -> (i32, i32, i32) {
    %c0_i32 = arith.constant 0 : i32
    %c0_i32_0 = arith.constant 0 : i32
    %c0_i32_1 = arith.constant 0 : i32
    return %arg0, %c0_i32, %c0_i32_0 : i32, i32, i32
  }
}

</mosaic_0001>

<bundles_post_ra>
// kernel: image_preprocess.1
= control target key start
LH: loop header
LB: loop body
LE: loop exit
PB: predicated region body
PF: predicated region fallthrough
CT: control target
= control target key end

     0   :  { %v50_v0 = vlaneseq  ;;  %vm434_vm0 = vcmask 1040384   ;;  %s1225_s0 = inlined_call_operand.vmem [shape: f32[2,1,3072], index: 0, kind: input, shape index: {}]   ;;  %s1226_s1 = inlined_call_operand.vmem [shape: f32[2,4,3072], index: 1, kind: input, shape index: {}]   ;;  %s1227_s2 = inlined_call_operand.vmem [shape: f32[5,3072], index: 2, kind: input, shape index: {}]   ;;  %s1228_s3 = inlined_call_operand.vmem [shape: f32[2,5,3072], index: 3, kind: output, shape index: {}]  }
   0x1   :  { %v20_v1 = vld [vmem:[%s1226_s1] sm:$0xff]  ;;  %v21_v5 = vld [vmem:[%s1226_s1 + $0x8] sm:$0xff]  ;;  %v22_v6 = vld [vmem:[%s1226_s1 + $0x10] sm:$0xff] }
   0x2   :  { %v51_v2 = vshrl.u32 %v50_v0, 7  ;;  %v338_v3 = vrot.slane %v20_v1, 7  ;;  %v314_v4 = vcombine.high %v20_v1, %v20_v1  ;;  %v663_v7 = vld [vmem:[%s1225_s0] sm:$0xff]  ;;  %v340_v8 = vrot.slane %v21_v5, 7  ;;  %v689_v23 = vld [vmem:[%s1227_s2 + $0x8] sm:$0x1f] }
   0x3   :  { %v315_v9 = vcombine.high %v21_v5, %v21_v5  ;;  %v342_v10 = vrot.slane %v22_v6, 7  ;;  %v316_v11 = vcombine.high %v22_v6, %v22_v6  ;;  %v674_v16 = vld [vmem:[%s1227_s2] sm:$0x1f]  ;;  %v696_v25 = vld [vmem:[%s1227_s2 + $0x10] sm:$0x1f]  ;;  %v23_v31 = vld [vmem:[%s1226_s1 + $0x18] sm:$0xff] }
   0x4   :  { %v665_v12 = vsub.s32 0, %v51_v2  ;;  %v667_v13 = vsub.s32 1, %v51_v2  ;;  %v339_v14 = vrot.slane %v314_v4, 7  ;;  %v669_v15 = vsub.s32 2, %v51_v2  ;;  %v703_v28 = vld [vmem:[%s1227_s2 + $0x18] sm:$0x1f] }
   0x5   :  { %v676_v17 = vsub.s32 3, %v51_v2  ;;  %v341_v18 = vrot.slane %v315_v9, 7  ;;  %v678_v19 = vsub.s32 4, %v51_v2  ;;  %v680_v20 = vsub.s32 5, %v51_v2  ;;  %v720_v36 = vld [vmem:[%s1227_s2 + $0x20] sm:$0x1f] }
   0x6   :  { %v53_v21 = vrot.slane %v663_v7, %v665_v12  ;;  %v57_v22 = vrot.slane %v663_v7, %v667_v13  ;;  %v61_v24 = vrot.slane %v663_v7, %v669_v15  ;;  %v343_v26 = vrot.slane %v316_v11, 7  ;;  %v725_v37 = vld [vmem:[%s1227_s2 + $0x28] sm:$0x1f]  ;;  %v744_v48 = vld [vmem:[%s1227_s2 + $0x30] sm:$0x1f]  ;;  %v24_v49 = vld [vmem:[%s1226_s1 + $0x20] sm:$0xff] }
   0x7   :  { %v65_v27 = vrot.slane %v663_v7, %v676_v17  ;;  %v69_v29 = vrot.slane %v663_v7, %v678_v19  ;;  %v73_v30 = vrot.slane %v663_v7, %v680_v20  ;;  %v712_v32 = vsub.s32 6, %v51_v2  ;;  %v734_v43 = vld [vmem:[%s1225_s0 + $0x8] sm:$0xff]  ;;  %v771_v57 = vld [vmem:[%s1227_s2 + $0x40] sm:$0x1f]  ;;  %v790_v63 = vld [vmem:[%s1227_s2 + $0x38] sm:$0x1f] }
   0x8   :  { %v435_v33 = vsel %vm434_vm0, %v53_v21, %v338_v3  ;;  %v436_v34 = vsel %vm434_vm0, %v57_v22, %v339_v14  ;;  %v437_v35 = vsel %vm434_vm0, %v61_v24, %v340_v8  ;;  %v344_v38 = vrot.slane %v23_v31, 7  ;;  %v25_v59 = vld [vmem:[%s1226_s1 + $0x28] sm:$0xff]  ;;  %v798_v4 = vld [vmem:[%s1227_s2 + $0x50] sm:$0x1f]  ;;  %v822_v24 = vld [vmem:[%s1227_s2 + $0x60] sm:$0x1f] }
   0x9   :  { %v507_v39 = vadd.f32 %v674_v16, %v435_v33  ;;  %v508_v40 = vadd.f32 %v689_v23, %v436_v34  ;;  %v509_v41 = vadd.f32 %v696_v25, %v437_v35  ;;  %v438_v42 = vsel %vm434_vm0, %v65_v27, %v341_v18  ;;  %v810_v9 = vld [vmem:[%s1227_s2 + $0x48] sm:$0x1f]  ;;  %v26_v11 = vld [vmem:[%s1226_s1 + $0x30] sm:$0xff]  ;;  %v27_v33 = vld [vmem:[%s1226_s1 + $0x38] sm:$0xff] }
   0xa   :  { %v510_v44 = vadd.f32 %v703_v28, %v438_v42  ;;  %v439_v45 = vsel %vm434_vm0, %v69_v29, %v342_v10  ;;  %v440_v46 = vsel %vm434_vm0, %v73_v30, %v343_v26  ;;  %v77_v47 = vrot.slane %v663_v7, %v712_v32  ;;  %v832_v30 = vld [vmem:[%s1227_s2 + $0x58] sm:$0x1f]  ;;  %v842_v34 = vld [vmem:[%s1225_s0 + $0x10] sm:$0xff] }
   0xb   :  { %555 = vst [vmem:[%s1228_s3] sm:$0x1f] %v507_v39  ;;  %556 = vst [vmem:[%s1228_s3 + $0x8] sm:$0x1f] %v508_v40  ;;  %v511_v50 = vadd.f32 %v720_v36, %v439_v45  ;;  %v512_v51 = vadd.f32 %v725_v37, %v440_v46  ;;  %v760_v52 = vsub.s32 7, %v51_v2  ;;  %v317_v53 = vcombine.high %v23_v31, %v23_v31  ;;  %v862_v46 = vld [vmem:[%s1227_s2 + $0x70] sm:$0x1f] }
   0xc   :  { %557 = vst [vmem:[%s1228_s3 + $0x10] sm:$0x1f] %v509_v41  ;;  %558 = vst [vmem:[%s1228_s3 + $0x18] sm:$0x1f] %v510_v44  ;;  %v441_v54 = vsel %vm434_vm0, %v77_v47, %v344_v38  ;;  %v85_v55 = vrot.slane %v734_v43, %v665_v12  ;;  %v346_v56 = vrot.slane %v24_v49, 7  ;;  %v89_v58 = vrot.slane %v734_v43, %v667_v13  ;;  %v28_v41 = vld [vmem:[%s1226_s1 + $0x40] sm:$0xff] }
   0xd   :  { %559 = vst [vmem:[%s1228_s3 + $0x20] sm:$0x1f] %v511_v50  ;;  %560 = vst [vmem:[%s1228_s3 + $0x28] sm:$0x1f] %v512_v51  ;;  %v513_v60 = vadd.f32 %v744_v48, %v441_v54  ;;  %v81_v61 = vrot.slane %v663_v7, %v760_v52  ;;  %v345_v62 = vrot.slane %v317_v53, 7  ;;  %v318_v0 = vcombine.high %v24_v49, %v24_v49 }
   0xe   :  { %v443_v1 = vsel %vm434_vm0, %v85_v55, %v346_v56  ;;  %v93_v2 = vrot.slane %v734_v43, %v669_v15  ;;  %v348_v3 = vrot.slane %v25_v59, 7  ;;  %v97_v5 = vrot.slane %v734_v43, %v676_v17  ;;  %v873_v51 = vld [vmem:[%s1227_s2 + $0x68] sm:$0x1f]  ;;  %v884_v56 = vld [vmem:[%s1227_s2 + $0x80] sm:$0x1f] }
   0xf   :  { %561 = vst [vmem:[%s1228_s3 + $0x30] sm:$0x1f] %v513_v60  ;;  %v442_v6 = vsel %vm434_vm0, %v81_v61, %v345_v62  ;;  %v515_v7 = vadd.f32 %v771_v57, %v443_v1  ;;  %v347_v8 = vrot.slane %v318_v0, 7  ;;  %v319_v10 = vcombine.high %v25_v59, %v25_v59  ;;  %v29_v60 = vld [vmem:[%s1226_s1 + $0x48] sm:$0xff]  ;;  %v899_v1 = vld [vmem:[%s1227_s2 + $0x78] sm:$0x1f] }
  0x10   :  { %v514_v14 = vadd.f32 %v790_v63, %v442_v6  ;;  %v445_v18 = vsel %vm434_vm0, %v93_v2, %v348_v3  ;;  %v101_v21 = vrot.slane %v734_v43, %v678_v19  ;;  %v350_v22 = vrot.slane %v26_v11, 7 }
  0x11   :  { %563 = vst [vmem:[%s1228_s3 + $0x40] sm:$0x1f] %v515_v7  ;;  %v444_v26 = vsel %vm434_vm0, %v89_v58, %v347_v8  ;;  %v517_v27 = vadd.f32 %v798_v4, %v445_v18  ;;  %v349_v29 = vrot.slane %v319_v10, 7  ;;  %v105_v31 = vrot.slane %v734_v43, %v680_v20  ;;  %v908_v7 = vld [vmem:[%s1227_s2 + $0x88] sm:$0x1f] }
  0x12   :  { %562 = vst [vmem:[%s1228_s3 + $0x38] sm:$0x1f] %v514_v14  ;;  %v516_v35 = vadd.f32 %v810_v9, %v444_v26  ;;  %v447_v38 = vsel %vm434_vm0, %v101_v21, %v350_v22  ;;  %v320_v39 = vcombine.high %v26_v11, %v26_v11  ;;  %v109_v40 = vrot.slane %v734_v43, %v712_v32  ;;  %v913_v10 = vld [vmem:[%s1227_s2 + $0x90] sm:$0x1f] }
  0x13   :  { %565 = vst [vmem:[%s1228_s3 + $0x50] sm:$0x1f] %v517_v27  ;;  %v446_v42 = vsel %vm434_vm0, %v97_v5, %v349_v29  ;;  %v519_v44 = vadd.f32 %v822_v24, %v447_v38  ;;  %v352_v45 = vrot.slane %v27_v33, 7  ;;  %v113_v47 = vrot.slane %v734_v43, %v760_v52  ;;  %v30_v22 = vld [vmem:[%s1226_s1 + $0x50] sm:$0xff] }
  0x14   :  { %564 = vst [vmem:[%s1228_s3 + $0x48] sm:$0x1f] %v516_v35  ;;  %v518_v49 = vadd.f32 %v832_v30, %v446_v42  ;;  %v351_v50 = vrot.slane %v320_v39, 7  ;;  %v321_v53 = vcombine.high %v27_v33, %v27_v33  ;;  %v117_v54 = vrot.slane %v842_v34, %v665_v12  ;;  %v31_v33 = vld [vmem:[%s1226_s1 + $0x58] sm:$0xff]  ;;  %v949_v42 = vld [vmem:[%s1227_s2 + $0xa0] sm:$0x1f] }
  0x15   :  { %567 = vst [vmem:[%s1228_s3 + $0x60] sm:$0x1f] %v519_v44  ;;  %v449_v43 = vsel %vm434_vm0, %v109_v40, %v352_v45  ;;  %v354_v55 = vrot.slane %v28_v41, 7  ;;  %v121_v58 = vrot.slane %v842_v34, %v667_v13  ;;  %v322_v59 = vcombine.high %v28_v41, %v28_v41  ;;  %v944_v40 = vld [vmem:[%s1227_s2 + $0x98] sm:$0x1f] }
  0x16   :  { %566 = vst [vmem:[%s1228_s3 + $0x58] sm:$0x1f] %v518_v49  ;;  %v448_v61 = vsel %vm434_vm0, %v105_v31, %v351_v50  ;;  %v521_v62 = vadd.f32 %v862_v46, %v449_v43  ;;  %v353_v0 = vrot.slane %v321_v53, 7  ;;  %v125_v2 = vrot.slane %v842_v34, %v669_v15  ;;  %v961_v50 = vld [vmem:[%s1227_s2 + $0xb0] sm:$0x1f]  ;;  %v966_v53 = vld [vmem:[%s1225_s0 + $0x18] sm:$0xff] }
  0x17   :  { %v520_v3 = vadd.f32 %v873_v51, %v448_v61  ;;  %v451_v5 = vsel %vm434_vm0, %v117_v54, %v354_v55  ;;  %v355_v6 = vrot.slane %v322_v59, 7  ;;  %v356_v8 = vrot.slane %v29_v60, 7  ;;  %v32_v59 = vld [vmem:[%s1226_s1 + $0x60] sm:$0xff] }
  0x18   :  { %569 = vst [vmem:[%s1228_s3 + $0x70] sm:$0x1f] %v521_v62  ;;  %v450_v11 = vsel %vm434_vm0, %v113_v47, %v353_v0  ;;  %v523_v14 = vadd.f32 %v884_v56, %v451_v5  ;;  %v129_v18 = vrot.slane %v842_v34, %v676_v17  ;;  %v323_v21 = vcombine.high %v29_v60, %v29_v60  ;;  %v986_v0 = vld [vmem:[%s1227_s2 + $0xa8] sm:$0x1f]  ;;  %v993_v5 = vld [vmem:[%s1227_s2 + $0xb8] sm:$0x1f] }
  0x19   :  { %568 = vst [vmem:[%s1228_s3 + $0x68] sm:$0x1f] %v520_v3  ;;  %v522_v26 = vadd.f32 %v899_v1, %v450_v11  ;;  %v452_v27 = vsel %vm434_vm0, %v121_v58, %v355_v6  ;;  %v453_v29 = vsel %vm434_vm0, %v125_v2, %v356_v8  ;;  %v133_v31 = vrot.slane %v842_v34, %v678_v19 }
  0x1a   :  { %571 = vst [vmem:[%s1228_s3 + $0x80] sm:$0x1f] %v523_v14  ;;  %v524_v35 = vadd.f32 %v908_v7, %v452_v27  ;;  %v525_v38 = vadd.f32 %v913_v10, %v453_v29  ;;  %v357_v39 = vrot.slane %v323_v21, 7  ;;  %v358_v41 = vrot.slane %v30_v22, 7  ;;  %v33_v21 = vld [vmem:[%s1226_s1 + $0x68] sm:$0xff] }
  0x1b   :  { %570 = vst [vmem:[%s1228_s3 + $0x78] sm:$0x1f] %v522_v26  ;;  %v137_v44 = vrot.slane %v842_v34, %v680_v20  ;;  %v324_v45 = vcombine.high %v30_v22, %v30_v22  ;;  %v141_v47 = vrot.slane %v842_v34, %v712_v32  ;;  %v360_v49 = vrot.slane %v31_v33, 7 }
  0x1c   :  { %572 = vst [vmem:[%s1228_s3 + $0x88] sm:$0x1f] %v524_v35  ;;  %573 = vst [vmem:[%s1228_s3 + $0x90] sm:$0x1f] %v525_v38  ;;  %v454_v54 = vsel %vm434_vm0, %v129_v18, %v357_v39  ;;  %v455_v43 = vsel %vm434_vm0, %v133_v31, %v358_v41  ;;  %v145_v55 = vrot.slane %v842_v34, %v760_v52  ;;  %v362_v8 = vrot.slane %v32_v59, 7 }
  0x1d   :  { %v325_v58 = vcombine.high %v31_v33, %v31_v33  ;;  %v526_v60 = vadd.f32 %v944_v40, %v454_v54  ;;  %v527_v61 = vadd.f32 %v949_v42, %v455_v43  ;;  %v359_v62 = vrot.slane %v324_v45, 7  ;;  %v34_v33 = vld [vmem:[%s1226_s1 + $0x70] sm:$0xff] }
  0x1e   :  { %v457_v2 = vsel %vm434_vm0, %v141_v47, %v360_v49  ;;  %v149_v6 = vrot.slane %v966_v53, %v665_v12  ;;  %v153_v14 = vrot.slane %v966_v53, %v667_v13  ;;  %v326_v18 = vcombine.high %v32_v59, %v32_v59  ;;  %v1046_v59 = vld [vmem:[%s1225_s0 + $0x20] sm:$0xff] }
  0x1f   :  { %v529_v3 = vadd.f32 %v961_v50, %v457_v2  ;;  %v361_v34 = vrot.slane %v325_v58, 7  ;;  %574 = vst [vmem:[%s1228_s3 + $0x98] sm:$0x1f] %v526_v60  ;;  %575 = vst [vmem:[%s1228_s3 + $0xa0] sm:$0x1f] %v527_v61  ;;  %v456_v11 = vsel %vm434_vm0, %v137_v44, %v359_v62  ;;  %v157_v22 = vrot.slane %v966_v53, %v669_v15  ;;  %v35_v58 = vld [vmem:[%s1226_s1 + $0x78] sm:$0xff] }
  0x20   :  { %v528_v26 = vadd.f32 %v986_v0, %v456_v11  ;;  %v459_v29 = vsel %vm434_vm0, %v149_v6, %v362_v8  ;;  %v364_v31 = vrot.slane %v33_v21, 7  ;;  %v363_v39 = vrot.slane %v326_v18, 7 }
  0x21   :  { %577 = vst [vmem:[%s1228_s3 + $0xb0] sm:$0x1f] %v529_v3  ;;  %v458_v27 = vsel %vm434_vm0, %v145_v55, %v361_v34  ;;  %v531_v38 = vadd.f32 %v674_v16, %v459_v29  ;;  %v161_v41 = vrot.slane %v966_v53, %v676_v17  ;;  %v327_v45 = vcombine.high %v33_v21, %v33_v21 }
  0x22   :  { %v530_v35 = vadd.f32 %v993_v5, %v458_v27  ;;  %576 = vst [vmem:[%s1228_s3 + $0xa8] sm:$0x1f] %v528_v26  ;;  %v461_v44 = vsel %vm434_vm0, %v157_v22, %v364_v31  ;;  %v165_v47 = vrot.slane %v966_v53, %v678_v19  ;;  %v366_v49 = vrot.slane %v34_v33, 7  ;;  %v37_v26 = vld [vmem:[%s1226_s1 + $0x88] sm:$0xff] }
  0x23   :  { %579 = vst [vmem:[%s1228_s3 + $0xc0] sm:$0x1f] %v531_v38  ;;  %v460_v16 = vsel %vm434_vm0, %v153_v14, %v363_v39  ;;  %v533_v54 = vadd.f32 %v696_v25, %v461_v44  ;;  %v169_v43 = vrot.slane %v966_v53, %v680_v20  ;;  %v328_v55 = vcombine.high %v34_v33, %v34_v33 }
  0x24   :  { %578 = vst [vmem:[%s1228_s3 + $0xb8] sm:$0x1f] %v530_v35  ;;  %v532_v60 = vadd.f32 %v689_v23, %v460_v16  ;;  %v365_v61 = vrot.slane %v327_v45, 7  ;;  %v463_v62 = vsel %vm434_vm0, %v165_v47, %v366_v49  ;;  %v173_v25 = vrot.slane %v966_v53, %v712_v32  ;;  %v36_v23 = vld [vmem:[%s1226_s1 + $0x80] sm:$0xff] }
  0x25   :  { %581 = vst [vmem:[%s1228_s3 + $0xd0] sm:$0x1f] %v533_v54  ;;  %v535_v2 = vadd.f32 %v720_v36, %v463_v62  ;;  %v367_v3 = vrot.slane %v328_v55, 7  ;;  %v368_v34 = vrot.slane %v35_v58, 7  ;;  %v177_v6 = vrot.slane %v966_v53, %v760_v52 }
  0x26   :  { %580 = vst [vmem:[%s1228_s3 + $0xc8] sm:$0x1f] %v532_v60  ;;  %v462_v8 = vsel %vm434_vm0, %v161_v41, %v365_v61  ;;  %v329_v11 = vcombine.high %v35_v58, %v35_v58  ;;  %v181_v14 = vrot.slane %v1046_v59, %v665_v12  ;;  %v370_v36 = vrot.slane %v36_v23, 7  ;;  %v39_v60 = vld [vmem:[%s1226_s1 + $0x98] sm:$0xff] }
  0x27   :  { %v534_v18 = vadd.f32 %v703_v28, %v462_v8  ;;  %583 = vst [vmem:[%s1228_s3 + $0xe0] sm:$0x1f] %v535_v2  ;;  %v464_v53 = vsel %vm434_vm0, %v169_v43, %v367_v3  ;;  %v465_v21 = vsel %vm434_vm0, %v173_v25, %v368_v34  ;;  %v185_v22 = vrot.slane %v1046_v59, %v667_v13  ;;  %v1122_v25 = vld [vmem:[%s1225_s0 + $0x28] sm:$0xff] }
  0x28   :  { %v536_v27 = vadd.f32 %v725_v37, %v464_v53  ;;  %v537_v29 = vadd.f32 %v744_v48, %v465_v21  ;;  %v369_v28 = vrot.slane %v329_v11, 7  ;;  %v467_v31 = vsel %vm434_vm0, %v181_v14, %v370_v36  ;;  %v38_v37 = vld [vmem:[%s1226_s1 + $0x90] sm:$0xff] }
  0x29   :  { %582 = vst [vmem:[%s1228_s3 + $0xd8] sm:$0x1f] %v534_v18  ;;  %v539_v33 = vadd.f32 %v771_v57, %v467_v31  ;;  %v330_v35 = vcombine.high %v36_v23, %v36_v23  ;;  %v189_v38 = vrot.slane %v1046_v59, %v669_v15  ;;  %v372_v39 = vrot.slane %v37_v26, 7  ;;  %v40_v23 = vld [vmem:[%s1226_s1 + $0xa0] sm:$0xff] }
  0x2a   :  { %584 = vst [vmem:[%s1228_s3 + $0xe8] sm:$0x1f] %v536_v27  ;;  %585 = vst [vmem:[%s1228_s3 + $0xf0] sm:$0x1f] %v537_v29  ;;  %v466_v48 = vsel %vm434_vm0, %v177_v6, %v369_v28  ;;  %v193_v57 = vrot.slane %v1046_v59, %v676_v17  ;;  %v331_v41 = vcombine.high %v37_v26, %v37_v26  ;;  %v374_v16 = vrot.slane %v38_v37, 7 }
  0x2b   :  { %v197_v44 = vrot.slane %v1046_v59, %v678_v19  ;;  %v538_v45 = vadd.f32 %v790_v63, %v466_v48  ;;  %587 = vst [vmem:[%s1228_s3 + $0x100] sm:$0x1f] %v539_v33  ;;  %v371_v47 = vrot.slane %v330_v35, 7  ;;  %v469_v49 = vsel %vm434_vm0, %v189_v38, %v372_v39  ;;  %v42_v33 = vld [vmem:[%s1226_s1 + $0xb0] sm:$0xff] }
  0x2c   :  { %v541_v54 = vadd.f32 %v798_v4, %v469_v49  ;;  %v373_v43 = vrot.slane %v331_v41, 7  ;;  %v201_v55 = vrot.slane %v1046_v59, %v680_v20  ;;  %v332_v58 = vcombine.high %v38_v37, %v38_v37 }
  0x2d   :  { %586 = vst [vmem:[%s1228_s3 + $0xf8] sm:$0x1f] %v538_v45  ;;  %v468_v63 = vsel %vm434_vm0, %v185_v22, %v371_v47  ;;  %v471_v61 = vsel %vm434_vm0, %v197_v44, %v374_v16  ;;  %v205_v4 = vrot.slane %v1046_v59, %v712_v32  ;;  %v376_v62 = vrot.slane %v39_v60, 7 }
  0x2e   :  { %v540_v2 = vadd.f32 %v810_v9, %v468_v63  ;;  %589 = vst [vmem:[%s1228_s3 + $0x110] sm:$0x1f] %v541_v54  ;;  %v470_v3 = vsel %vm434_vm0, %v193_v57, %v373_v43  ;;  %v543_v34 = vadd.f32 %v822_v24, %v471_v61  ;;  %v375_v6 = vrot.slane %v332_v58, 7 }
  0x2f   :  { %v542_v8 = vadd.f32 %v832_v30, %v470_v3  ;;  %v473_v11 = vsel %vm434_vm0, %v205_v4, %v376_v62  ;;  %v209_v9 = vrot.slane %v1046_v59, %v760_v52  ;;  %v333_v14 = vcombine.high %v39_v60, %v39_v60  ;;  %v41_v59 = vld [vmem:[%s1226_s1 + $0xa8] sm:$0xff] }
  0x30   :  { %588 = vst [vmem:[%s1228_s3 + $0x108] sm:$0x1f] %v540_v2  ;;  %591 = vst [vmem:[%s1228_s3 + $0x120] sm:$0x1f] %v543_v34  ;;  %v472_v24 = vsel %vm434_vm0, %v201_v55, %v375_v6  ;;  %v545_v36 = vadd.f32 %v862_v46, %v473_v11  ;;  %v213_v30 = vrot.slane %v1122_v25, %v665_v12  ;;  %v378_v18 = vrot.slane %v40_v23, 7 }
  0x31   :  { %590 = vst [vmem:[%s1228_s3 + $0x118] sm:$0x1f] %v542_v8  ;;  %v544_v53 = vadd.f32 %v873_v51, %v472_v24  ;;  %v377_v21 = vrot.slane %v333_v14, 7  ;;  %v217_v22 = vrot.slane %v1122_v25, %v667_v13  ;;  %v334_v26 = vcombine.high %v40_v23, %v40_v23 }
  0x32   :  { %593 = vst [vmem:[%s1228_s3 + $0x130] sm:$0x1f] %v545_v36  ;;  %v475_v12 = vsel %vm434_vm0, %v213_v30, %v378_v18  ;;  %v221_v46 = vrot.slane %v1122_v25, %v669_v15  ;;  %v380_v27 = vrot.slane %v41_v59, 7  ;;  %v225_v29 = vrot.slane %v1122_v25, %v676_v17 }
  0x33   :  { %592 = vst [vmem:[%s1228_s3 + $0x128] sm:$0x1f] %v544_v53  ;;  %v474_v13 = vsel %vm434_vm0, %v209_v9, %v377_v21  ;;  %v547_v51 = vadd.f32 %v884_v56, %v475_v12  ;;  %v379_v28 = vrot.slane %v334_v26, 7  ;;  %v335_v31 = vcombine.high %v41_v59, %v41_v59 }
  0x34   :  { %v546_v15 = vadd.f32 %v899_v1, %v474_v13  ;;  %v477_v35 = vsel %vm434_vm0, %v221_v46, %v380_v27  ;;  %v229_v17 = vrot.slane %v1122_v25, %v678_v19  ;;  %v382_v38 = vrot.slane %v42_v33, 7  ;;  %v43_v1 = vld [vmem:[%s1226_s1 + $0xb8] sm:$0xff] }
  0x35   :  { %595 = vst [vmem:[%s1228_s3 + $0x140] sm:$0x1f] %v547_v51  ;;  %v476_v56 = vsel %vm434_vm0, %v217_v22, %v379_v28  ;;  %v549_v39 = vadd.f32 %v913_v10, %v477_v35  ;;  %v381_v37 = vrot.slane %v335_v31, 7  ;;  %v233_v48 = vrot.slane %v1122_v25, %v680_v20 }
  0x36   :  { %594 = vst [vmem:[%s1228_s3 + $0x138] sm:$0x1f] %v546_v15  ;;  %v548_v19 = vadd.f32 %v908_v7, %v476_v56  ;;  %v479_v57 = vsel %vm434_vm0, %v229_v17, %v382_v38  ;;  %v336_v41 = vcombine.high %v42_v33, %v42_v33  ;;  %v237_v10 = vrot.slane %v1122_v25, %v712_v32 }
  0x37   :  { %597 = vst [vmem:[%s1228_s3 + $0x150] sm:$0x1f] %v549_v39  ;;  %v478_v20 = vsel %vm434_vm0, %v225_v29, %v381_v37  ;;  %v551_v44 = vadd.f32 %v949_v42, %v479_v57  ;;  %v384_v45 = vrot.slane %v43_v1, 7  ;;  %v241_v49 = vrot.slane %v1122_v25, %v760_v52 }
  0x38   :  { %596 = vst [vmem:[%s1228_s3 + $0x148] sm:$0x1f] %v548_v19  ;;  %v550_v7 = vadd.f32 %v944_v40, %v478_v20  ;;  %v383_v47 = vrot.slane %v336_v41, 7  ;;  %v337_v32 = vcombine.high %v43_v1, %v43_v1 }
  0x39   :  { %599 = vst [vmem:[%s1228_s3 + $0x160] sm:$0x1f] %v551_v44  ;;  %v481_v16 = vsel %vm434_vm0, %v237_v10, %v384_v45 }
  0x3a   :  { %598 = vst [vmem:[%s1228_s3 + $0x158] sm:$0x1f] %v550_v7  ;;  %v480_v42 = vsel %vm434_vm0, %v233_v48, %v383_v47  ;;  %v553_v54 = vadd.f32 %v961_v50, %v481_v16  ;;  %v385_v40 = vrot.slane %v337_v32, 7 }
  0x3b   :  { %v552_v43 = vadd.f32 %v986_v0, %v480_v42 }
  0x3c   :  { %601 = vst [vmem:[%s1228_s3 + $0x170] sm:$0x1f] %v553_v54  ;;  %v482_v52 = vsel %vm434_vm0, %v241_v49, %v385_v40 }
  0x3d   :  { %600 = vst [vmem:[%s1228_s3 + $0x168] sm:$0x1f] %v552_v43  ;;  %v554_v55 = vadd.f32 %v993_v5, %v482_v52 }
  0x3f   :  { %602 = vst [vmem:[%s1228_s3 + $0x178] sm:$0x1f] %v554_v55 }

</bundles_post_ra>
